<compile_context>
chip_gen: v7x
topology: tpu7x:2x2x1
jax: 0.10.0
libtpu: 0.0.40
codegen_flags: <defaults>
</compile_context>

<pallas_src>
import functools

import jax
import jax.numpy as jnp
from jax import lax
from jax.experimental import pallas as pl
from jax.experimental.pallas import tpu as pltpu


def _round_up(a, m):
    return ((a + m - 1) // m) * m


def _pick_col_tile(total_cols, k_pad, c_in, c_out, halo,
                   vmem_budget=12 * 1024 * 1024):
    """Lane-dense (multiple-of-128) matmul column tile.

    Capped so slab + double-buffered halo window + double-buffered output block +
    weights fit a conservative VMEM budget (works with v5e/v6e/v7x scoped defaults),
    and preferring >= 2 tiles per image so the halo-DMA prefetch / output writeback
    actually overlap with compute.
    """
    best = 128
    for nc in (256, 512, 1024, 2048):
        if nc > _round_up(total_cols, 128):
            break
        win = nc + _round_up(halo, 128)
        vmem = 4 * (k_pad * nc          # im2col slab scratch
                    + 2 * c_in * win    # double-buffered halo window
                    + 2 * c_out * nc    # double-buffered output block
                    + 2 * c_out * (k_pad + 1))  # weights + bias
        if vmem > vmem_budget:
            break
        if pl.cdiv(total_cols, nc) < 2:
            break
        best = nc
    return best


def _conv_im2col_kernel(w_ref, b_ref, x_hbm, o_ref, xwin_ref, slab_ref, sem,
                        *, ksize, c_in, w_pad, nc, win, n_tiles, k_rows, k_pad):
    # w_ref:    (C_out, K_pad)   flattened conv weights (zero-padded cols), resident
    # b_ref:    (C_out, 1)       bias, resident
    # x_hbm:    (B, C_in, L)     flat reflection-padded input, stays in HBM
    # o_ref:    (1, C_out, nc)   lane-dense output tile
    # xwin_ref: (2, C_in, win)   double-buffered halo window (VMEM scratch)
    # slab_ref: (K_pad, nc)      im2col patch slab (VMEM scratch)
    b = pl.program_id(0)
    t = pl.program_id(1)
    slot = t % 2

    def start_fetch(tile, slot_):
        col0 = pl.multiple_of(tile * nc, 128)
        pltpu.make_async_copy(
            x_hbm.at[b, :, pl.ds(col0, win)], xwin_ref.at[slot_], sem.at[slot_],
        ).start()

    # Prime the double buffer at the first column tile of each image.
    @pl.when(t == 0)
    def _():
        start_fetch(0, slot)

    # Wait for the current tile's halo window (prefetched by the previous step,
    # or by the prime above).
    col0_cur = pl.multiple_of(t * nc, 128)
    pltpu.make_async_copy(
        x_hbm.at[b, :, pl.ds(col0_cur, win)], xwin_ref.at[slot], sem.at[slot],
    ).wait()

    # Prefetch the next tile of the same image while we compute this one.
    @pl.when(t + 1 < n_tiles)
    def _():
        start_fetch(t + 1, 1 - slot)

    # Zero the K-alignment tail rows (static, only emitted if K % 8 != 0).
    if k_pad > k_rows:
        slab_ref[k_rows:, :] = jnp.zeros((k_pad - k_rows, nc), jnp.float32)

    # In-kernel im2col: one static lane-shifted slice per conv tap.
    # Slab rows are ordered (kh, kw, c_in), matching the flattened weight layout.
    xw = xwin_ref[slot]                                      # (C_in, win)
    for kh in range(ksize):
        for kw in range(ksize):
            tap = kh * ksize + kw
            shift = kh * w_pad + kw                          # static lane shift
            slab_ref[tap * c_in:(tap + 1) * c_in, :] = xw[:, shift:shift + nc]

    # One fused MXU matmul for the whole tile + VPU bias add.
    acc = jnp.dot(w_ref[...], slab_ref[...], preferred_element_type=jnp.float32)
    o_ref[0] = (acc + b_ref[...]).astype(o_ref.dtype)


def conv_withpad(x, weight, bias, *, stride=1, dilation=1, groups=1):
    """ReflectionPad2d(k//2) + Conv2d(stride=1, dilation=1, groups=1, bias=True).

    x: (B, C_in, H, W); weight: (C_out, C_in, k, k); bias: (C_out,).
    Returns (B, C_out, H, W) float32.
    """
    if stride != 1 or dilation != 1 or groups != 1:
        raise NotImplementedError(
            "conv_withpad only implements the nn.Conv2d defaults "
            "(stride=1, dilation=1, groups=1)")
    B, C_in, H, W = x.shape
    C_out, C_in_w, kh_sz, kw_sz = weight.shape
    assert C_in_w == C_in, "weight C_in mismatch"
    if kh_sz != kw_sz or kh_sz % 2 == 0:
        # TODO(synk): even kernel sizes change the output size under
        # ReflectionPad2d(k//2) + Conv2d(k); only odd square kernels implemented.
        raise NotImplementedError("only odd square kernel sizes are implemented")
    k = kh_sz
    pad = k // 2

    x = x.astype(jnp.float32)
    x_pad = jnp.pad(x, ((0, 0), (0, 0), (pad, pad), (pad, pad)), mode="reflect")
    H_pad, W_pad = H + 2 * pad, W + 2 * pad

    # Flattened-spatial formulation: output pixel (r, c) lives at flat column
    # p = r * W_pad + c, and the input element needed by tap (kh, kw) is the SAME
    # flat padded image shifted by kh * W_pad + kw.  Columns with c >= W are junk
    # (wrapped windows) and are discarded at the end; this keeps the in-kernel
    # im2col to k*k static contiguous lane slices with no reshapes.
    total_cols = H * W_pad                      # columns covering all valid pixels
    halo = (k - 1) * W_pad + (k - 1)            # largest tap shift
    K = k * k * C_in
    K_pad = _round_up(K, 8)                     # sublane-aligned contraction dim

    nc = _pick_col_tile(total_cols, K_pad, C_in, C_out, halo)
    n_tiles = pl.cdiv(total_cols, nc)
    ncols_total = n_tiles * nc
    win = nc + _round_up(halo, 128)             # lane-aligned halo window per tile
    L = ncols_total - nc + win                  # flat input length incl. zero tail

    x_flat = x_pad.reshape(B, C_in, H_pad * W_pad)
    x_flat = jnp.pad(x_flat, ((0, 0), (0, 0), (0, L - H_pad * W_pad)))

    # (C_out, C_in, kh, kw) -> (C_out, kh, kw, C_in) -> (C_out, K) [-> pad to K_pad]
    w_flat = weight.astype(jnp.float32).transpose(0, 2, 3, 1).reshape(C_out, K)
    if K_pad != K:
        w_flat = jnp.pad(w_flat, ((0, 0), (0, K_pad - K)))
    b_col = bias.astype(jnp.float32).reshape(C_out, 1)

    kernel = functools.partial(
        _conv_im2col_kernel, ksize=k, c_in=C_in, w_pad=W_pad,
        nc=nc, win=win, n_tiles=n_tiles, k_rows=K, k_pad=K_pad)

    out_cols = pl.pallas_call(
        kernel,
        out_shape=jax.ShapeDtypeStruct((B, C_out, ncols_total), jnp.float32),
        grid_spec=pltpu.PrefetchScalarGridSpec(
            num_scalar_prefetch=0,
            grid=(B, n_tiles),
            in_specs=[
                pl.BlockSpec((C_out, K_pad), lambda b, t: (0, 0)),  # weights resident
                pl.BlockSpec((C_out, 1), lambda b, t: (0, 0)),      # bias resident
                pl.BlockSpec(memory_space=pl.ANY),                  # x stays in HBM
            ],
            out_specs=pl.BlockSpec((1, C_out, nc), lambda b, t: (b, 0, t)),
            scratch_shapes=[
                pltpu.VMEM((2, C_in, win), jnp.float32),   # double-buffered halo window
                pltpu.VMEM((K_pad, nc), jnp.float32),      # im2col slab
                pltpu.SemaphoreType.DMA((2,)),
            ],
        ),
        compiler_params=pltpu.CompilerParams(
            dimension_semantics=("parallel", "arbitrary"),
        ),
    )(w_flat, b_col, x_flat)

    # Drop the junk / alignment columns: (B, C_out, H, W_pad)[..., :W].
    out = out_cols[:, :, :H * W_pad].reshape(B, C_out, H, W_pad)[:, :, :, :W]
    return out


def _reference(x, weight, bias):
    k = weight.shape[2]
    pad = k // 2
    x_pad = jnp.pad(x, ((0, 0), (0, 0), (pad, pad), (pad, pad)), mode="reflect")
    y = lax.conv_general_dilated(
        x_pad, weight, window_strides=(1, 1), padding="VALID",
        dimension_numbers=("NCHW", "OIHW", "NCHW"),
        precision=lax.Precision.HIGHEST)
    return y + bias[None, :, None, None]


if __name__ == "__main__":
    key = jax.random.PRNGKey(0)
    kx, kw, kb = jax.random.split(key, 3)

    B, C_in, C_out, H, W, ksize = 2, 4, 8, 16, 16, 3
    x = jax.random.normal(kx, (B, C_in, H, W), dtype=jnp.float32)
    weight = jax.random.normal(kw, (C_out, C_in, ksize, ksize), dtype=jnp.float32) * 0.1
    bias = jax.random.normal(kb, (C_out,), dtype=jnp.float32) * 0.1

    out = jax.block_until_ready(conv_withpad(x, weight, bias))

    ref = _reference(x, weight, bias)
    assert out.shape == (B, C_out, H, W)
    err = float(jnp.max(jnp.abs(out - ref)))
    assert jnp.allclose(out, ref, atol=1e-3, rtol=1e-3), (
        f"mismatch vs reference conv: max abs err {err:.3e}")

    print("KERNEL_OK")
</pallas_src>

<mosaic_0001>
module attributes {stable_mosaic.version = 11 : i64} {
  func.func @_conv_im2col_kernel(%arg0: i32, %arg1: i32, %arg2: memref<8x40xf32, #tpu.memory_space<vmem>>, %arg3: memref<8x1xf32, #tpu.memory_space<vmem>>, %arg4: memref<2x4x640xf32, #tpu.memory_space<any>>, %arg5: memref<1x8x256xf32, #tpu.memory_space<vmem>>, %arg6: memref<2x4x384xf32, #tpu.memory_space<vmem>>, %arg7: memref<40x256xf32, #tpu.memory_space<vmem>>, %arg8: memref<2x!tpu.dma_semaphore, #tpu.memory_space<semaphore_mem>>) attributes {dimension_semantics = [#tpu.dimension_semantics<parallel>, #tpu.dimension_semantics<arbitrary>], iteration_bounds = array<i64: 2, 2>, scalar_prefetch = 0 : i64, scratch_operands = 3 : i64, tpu.core_type = #tpu.core_type<tc>, window_params = [{pipeline_mode = #tpu.pipeline_mode<synchronous>, transform_indices = @transform_0, window_bounds = array<i64: 8, 40>}, {pipeline_mode = #tpu.pipeline_mode<synchronous>, transform_indices = @transform_1, window_bounds = array<i64: 8, 1>}, {}, {transform_indices = @transform_3, window_bounds = array<i64: 1, 8, 256>}]} {
    %c2_i32 = arith.constant 2 : i32
    %c0_i32 = arith.constant 0 : i32
    %0 = arith.cmpi eq, %c2_i32, %c0_i32 : i32
    %c1_i32 = arith.constant 1 : i32
    %1 = arith.select %0, %c1_i32, %c2_i32 : i32
    %2 = arith.remsi %arg1, %1 : i32
    %c0_i32_0 = arith.constant 0 : i32
    %3 = arith.cmpi ne, %2, %c0_i32_0 : i32
    %c0_i32_1 = arith.constant 0 : i32
    %4 = arith.cmpi slt, %2, %c0_i32_1 : i32
    %c0_i32_2 = arith.constant 0 : i32
    %5 = arith.cmpi slt, %1, %c0_i32_2 : i32
    %6 = arith.xori %4, %5 : i1
    %7 = arith.andi %6, %3 : i1
    %8 = arith.addi %2, %1 : i32
    %9 = arith.select %7, %8, %2 : i32
    %c0_i32_3 = arith.constant 0 : i32
    %10 = arith.cmpi eq, %arg1, %c0_i32_3 : i32
    %11 = arith.extui %10 : i1 to i32
    %c0_i32_4 = arith.constant 0 : i32
    %12 = arith.cmpi ne, %11, %c0_i32_4 : i32
    scf.if %12 {
      %c0_i32_33 = arith.constant 0 : i32
      %57 = tpu.assume_multiple %c0_i32_33, 128 : i32
      %c0_i32_34 = arith.constant 0 : i32
      %58 = tpu.memref_slice %arg4[%arg0, %c0_i32_34, %57] : memref<2x4x640xf32, #tpu.memory_space<any>> -> memref<1x4x384xf32, #tpu.memory_space<any>>
      %59 = tpu.memref_squeeze %58 : memref<1x4x384xf32, #tpu.memory_space<any>> -> memref<4x384xf32, #tpu.memory_space<any>>
      %c0_i32_35 = arith.constant 0 : i32
      %c0_i32_36 = arith.constant 0 : i32
      %60 = tpu.memref_slice %arg6[%9, %c0_i32_35, %c0_i32_36] : memref<2x4x384xf32, #tpu.memory_space<vmem>> -> memref<1x4x384xf32, #tpu.memory_space<vmem>>
      %61 = tpu.memref_squeeze %60 : memref<1x4x384xf32, #tpu.memory_space<vmem>> -> memref<4x384xf32, #tpu.memory_space<vmem>>
      %62 = tpu.memref_slice %arg8[%9] : memref<2x!tpu.dma_semaphore, #tpu.memory_space<semaphore_mem>> -> memref<1x!tpu.dma_semaphore, #tpu.memory_space<semaphore_mem>>
      %63 = tpu.memref_squeeze %62 : memref<1x!tpu.dma_semaphore, #tpu.memory_space<semaphore_mem>> -> memref<!tpu.dma_semaphore, #tpu.memory_space<semaphore_mem>>
      tpu.enqueue_dma source(%59 : memref<4x384xf32, #tpu.memory_space<any>>) target(%61 : memref<4x384xf32, #tpu.memory_space<vmem>>) target_semaphore(%63 : memref<!tpu.dma_semaphore, #tpu.memory_space<semaphore_mem>>)
    } else {
    }
    %c256_i32 = arith.constant 256 : i32
    %13 = arith.muli %arg1, %c256_i32 : i32
    %14 = tpu.assume_multiple %13, 128 : i32
    %c0_i32_5 = arith.constant 0 : i32
    %15 = tpu.memref_slice %arg4[%arg0, %c0_i32_5, %14] : memref<2x4x640xf32, #tpu.memory_space<any>> -> memref<1x4x384xf32, #tpu.memory_space<any>>
    %16 = tpu.memref_squeeze %15 : memref<1x4x384xf32, #tpu.memory_space<any>> -> memref<4x384xf32, #tpu.memory_space<any>>
    %c0_i32_6 = arith.constant 0 : i32
    %c0_i32_7 = arith.constant 0 : i32
    %17 = tpu.memref_slice %arg6[%9, %c0_i32_6, %c0_i32_7] : memref<2x4x384xf32, #tpu.memory_space<vmem>> -> memref<1x4x384xf32, #tpu.memory_space<vmem>>
    %18 = tpu.memref_squeeze %17 : memref<1x4x384xf32, #tpu.memory_space<vmem>> -> memref<4x384xf32, #tpu.memory_space<vmem>>
    %19 = tpu.memref_slice %arg8[%9] : memref<2x!tpu.dma_semaphore, #tpu.memory_space<semaphore_mem>> -> memref<1x!tpu.dma_semaphore, #tpu.memory_space<semaphore_mem>>
    %20 = tpu.memref_squeeze %19 : memref<1x!tpu.dma_semaphore, #tpu.memory_space<semaphore_mem>> -> memref<!tpu.dma_semaphore, #tpu.memory_space<semaphore_mem>>
    tpu.wait_dma2 semaphore(%20 : memref<!tpu.dma_semaphore, #tpu.memory_space<semaphore_mem>>) src(%16 : memref<4x384xf32, #tpu.memory_space<any>>) dst(%18 : memref<4x384xf32, #tpu.memory_space<vmem>>)
    %c1_i32_8 = arith.constant 1 : i32
    %21 = arith.addi %arg1, %c1_i32_8 : i32
    %c2_i32_9 = arith.constant 2 : i32
    %22 = arith.cmpi slt, %21, %c2_i32_9 : i32
    %23 = arith.extui %22 : i1 to i32
    %c0_i32_10 = arith.constant 0 : i32
    %24 = arith.cmpi ne, %23, %c0_i32_10 : i32
    scf.if %24 {
      %c1_i32_33 = arith.constant 1 : i32
      %57 = arith.addi %arg1, %c1_i32_33 : i32
      %c1_i32_34 = arith.constant 1 : i32
      %58 = arith.subi %c1_i32_34, %9 : i32
      %c256_i32_35 = arith.constant 256 : i32
      %59 = arith.muli %57, %c256_i32_35 : i32
      %60 = tpu.assume_multiple %59, 128 : i32
      %c0_i32_36 = arith.constant 0 : i32
      %61 = tpu.memref_slice %arg4[%arg0, %c0_i32_36, %60] : memref<2x4x640xf32, #tpu.memory_space<any>> -> memref<1x4x384xf32, #tpu.memory_space<any>>
      %62 = tpu.memref_squeeze %61 : memref<1x4x384xf32, #tpu.memory_space<any>> -> memref<4x384xf32, #tpu.memory_space<any>>
      %c0_i32_37 = arith.constant 0 : i32
      %c0_i32_38 = arith.constant 0 : i32
      %63 = tpu.memref_slice %arg6[%58, %c0_i32_37, %c0_i32_38] : memref<2x4x384xf32, #tpu.memory_space<vmem>> -> memref<1x4x384xf32, #tpu.memory_space<vmem>>
      %64 = tpu.memref_squeeze %63 : memref<1x4x384xf32, #tpu.memory_space<vmem>> -> memref<4x384xf32, #tpu.memory_space<vmem>>
      %65 = tpu.memref_slice %arg8[%58] : memref<2x!tpu.dma_semaphore, #tpu.memory_space<semaphore_mem>> -> memref<1x!tpu.dma_semaphore, #tpu.memory_space<semaphore_mem>>
      %66 = tpu.memref_squeeze %65 : memref<1x!tpu.dma_semaphore, #tpu.memory_space<semaphore_mem>> -> memref<!tpu.dma_semaphore, #tpu.memory_space<semaphore_mem>>
      tpu.enqueue_dma source(%62 : memref<4x384xf32, #tpu.memory_space<any>>) target(%64 : memref<4x384xf32, #tpu.memory_space<vmem>>) target_semaphore(%66 : memref<!tpu.dma_semaphore, #tpu.memory_space<semaphore_mem>>)
    } else {
    }
    %cst = arith.constant 0.000000e+00 : f32
    %25 = vector.broadcast %cst : f32 to vector<4x256xf32>
    %c36 = arith.constant 36 : index
    %c0 = arith.constant 0 : index
    %26 = vector.load %arg7[%c36, %c0] : memref<40x256xf32, #tpu.memory_space<vmem>>, vector<4x256xf32>
    tpu.vector_store %arg7[%c36, %c0], %25 {strides = array<i32>} : memref<40x256xf32, #tpu.memory_space<vmem>>, vector<4x256xf32>,
    %27 = arith.index_cast %9 : i32 to index
    %c0_11 = arith.constant 0 : index
    %c0_12 = arith.constant 0 : index
    %28 = vector.load %arg6[%27, %c0_11, %c0_12] : memref<2x4x384xf32, #tpu.memory_space<vmem>>, vector<1x4x384xf32>
    %29 = vector.shape_cast %28 : vector<1x4x384xf32> to vector<4x384xf32>
    %30 = vector.extract_strided_slice %29 {offsets = [0, 0], sizes = [4, 256], strides = [1, 1]} : vector<4x384xf32> to vector<4x256xf32>
    %c0_13 = arith.constant 0 : index
    %c0_14 = arith.constant 0 : index
    %31 = vector.load %arg7[%c0_13, %c0_14] : memref<40x256xf32, #tpu.memory_space<vmem>>, vector<4x256xf32>
    tpu.vector_store %arg7[%c0_13, %c0_14], %30 {strides = array<i32>} : memref<40x256xf32, #tpu.memory_space<vmem>>, vector<4x256xf32>,
    %32 = vector.extract_strided_slice %29 {offsets = [0, 1], sizes = [4, 256], strides = [1, 1]} : vector<4x384xf32> to vector<4x256xf32>
    %c4 = arith.constant 4 : index
    %c0_15 = arith.constant 0 : index
    %33 = vector.load %arg7[%c4, %c0_15] : memref<40x256xf32, #tpu.memory_space<vmem>>, vector<4x256xf32>
    tpu.vector_store %arg7[%c4, %c0_15], %32 {strides = array<i32>} : memref<40x256xf32, #tpu.memory_space<vmem>>, vector<4x256xf32>,
    %34 = vector.extract_strided_slice %29 {offsets = [0, 2], sizes = [4, 256], strides = [1, 1]} : vector<4x384xf32> to vector<4x256xf32>
    %c8 = arith.constant 8 : index
    %c0_16 = arith.constant 0 : index
    %35 = vector.load %arg7[%c8, %c0_16] : memref<40x256xf32, #tpu.memory_space<vmem>>, vector<4x256xf32>
    tpu.vector_store %arg7[%c8, %c0_16], %34 {strides = array<i32>} : memref<40x256xf32, #tpu.memory_space<vmem>>, vector<4x256xf32>,
    %36 = vector.extract_strided_slice %29 {offsets = [0, 18], sizes = [4, 256], strides = [1, 1]} : vector<4x384xf32> to vector<4x256xf32>
    %c12 = arith.constant 12 : index
    %c0_17 = arith.constant 0 : index
    %37 = vector.load %arg7[%c12, %c0_17] : memref<40x256xf32, #tpu.memory_space<vmem>>, vector<4x256xf32>
    tpu.vector_store %arg7[%c12, %c0_17], %36 {strides = array<i32>} : memref<40x256xf32, #tpu.memory_space<vmem>>, vector<4x256xf32>,
    %38 = vector.extract_strided_slice %29 {offsets = [0, 19], sizes = [4, 256], strides = [1, 1]} : vector<4x384xf32> to vector<4x256xf32>
    %c16 = arith.constant 16 : index
    %c0_18 = arith.constant 0 : index
    %39 = vector.load %arg7[%c16, %c0_18] : memref<40x256xf32, #tpu.memory_space<vmem>>, vector<4x256xf32>
    tpu.vector_store %arg7[%c16, %c0_18], %38 {strides = array<i32>} : memref<40x256xf32, #tpu.memory_space<vmem>>, vector<4x256xf32>,
    %40 = vector.extract_strided_slice %29 {offsets = [0, 20], sizes = [4, 256], strides = [1, 1]} : vector<4x384xf32> to vector<4x256xf32>
    %c20 = arith.constant 20 : index
    %c0_19 = arith.constant 0 : index
    %41 = vector.load %arg7[%c20, %c0_19] : memref<40x256xf32, #tpu.memory_space<vmem>>, vector<4x256xf32>
    tpu.vector_store %arg7[%c20, %c0_19], %40 {strides = array<i32>} : memref<40x256xf32, #tpu.memory_space<vmem>>, vector<4x256xf32>,
    %42 = vector.extract_strided_slice %29 {offsets = [0, 36], sizes = [4, 256], strides = [1, 1]} : vector<4x384xf32> to vector<4x256xf32>
    %c24 = arith.constant 24 : index
    %c0_20 = arith.constant 0 : index
    %43 = vector.load %arg7[%c24, %c0_20] : memref<40x256xf32, #tpu.memory_space<vmem>>, vector<4x256xf32>
    tpu.vector_store %arg7[%c24, %c0_20], %42 {strides = array<i32>} : memref<40x256xf32, #tpu.memory_space<vmem>>, vector<4x256xf32>,
    %44 = vector.extract_strided_slice %29 {offsets = [0, 37], sizes = [4, 256], strides = [1, 1]} : vector<4x384xf32> to vector<4x256xf32>
    %c28 = arith.constant 28 : index
    %c0_21 = arith.constant 0 : index
    %45 = vector.load %arg7[%c28, %c0_21] : memref<40x256xf32, #tpu.memory_space<vmem>>, vector<4x256xf32>
    tpu.vector_store %arg7[%c28, %c0_21], %44 {strides = array<i32>} : memref<40x256xf32, #tpu.memory_space<vmem>>, vector<4x256xf32>,
    %46 = vector.extract_strided_slice %29 {offsets = [0, 38], sizes = [4, 256], strides = [1, 1]} : vector<4x384xf32> to vector<4x256xf32>
    %c32 = arith.constant 32 : index
    %c0_22 = arith.constant 0 : index
    %47 = vector.load %arg7[%c32, %c0_22] : memref<40x256xf32, #tpu.memory_space<vmem>>, vector<4x256xf32>
    tpu.vector_store %arg7[%c32, %c0_22], %46 {strides = array<i32>} : memref<40x256xf32, #tpu.memory_space<vmem>>, vector<4x256xf32>,
    %c0_23 = arith.constant 0 : index
    %c0_24 = arith.constant 0 : index
    %48 = vector.load %arg2[%c0_23, %c0_24] : memref<8x40xf32, #tpu.memory_space<vmem>>, vector<8x40xf32>
    %c0_25 = arith.constant 0 : index
    %c0_26 = arith.constant 0 : index
    %49 = vector.load %arg7[%c0_25, %c0_26] : memref<40x256xf32, #tpu.memory_space<vmem>>, vector<40x256xf32>
    %cst_27 = arith.constant dense<0.000000e+00> : vector<8x256xf32>
    %50 = tpu.matmul %48, %49, %cst_27 {dimension_numbers = #tpu.dot_dimension_numbers<[1], [0], [0], [1], [0, 0, 1, 1], [], []>} : vector<8x40xf32>, vector<40x256xf32>, vector<8x256xf32> -> vector<8x256xf32>
    %c0_28 = arith.constant 0 : index
    %c0_29 = arith.constant 0 : index
    %51 = vector.load %arg3[%c0_28, %c0_29] : memref<8x1xf32, #tpu.memory_space<vmem>>, vector<8x1xf32>
    %52 = vector.broadcast %51 : vector<8x1xf32> to vector<8x256xf32>
    %53 = arith.addf %50, %52 : vector<8x256xf32>
    %c0_30 = arith.constant 0 : index
    %c0_31 = arith.constant 0 : index
    %c0_32 = arith.constant 0 : index
    %54 = vector.load %arg5[%c0_30, %c0_31, %c0_32] : memref<1x8x256xf32, #tpu.memory_space<vmem>>, vector<1x8x256xf32>
    %55 = vector.shape_cast %54 : vector<1x8x256xf32> to vector<8x256xf32>
    %56 = vector.shape_cast %53 : vector<8x256xf32> to vector<1x8x256xf32>
    tpu.vector_store %arg5[%c0_30, %c0_31, %c0_32], %56 {strides = array<i32>} : memref<1x8x256xf32, #tpu.memory_space<vmem>>, vector<1x8x256xf32>,
    return
  }
  func.func @transform_0(%arg0: i32, %arg1: i32) -> (i32, i32) {
    %c0_i32 = arith.constant 0 : i32
    %c0_i32_0 = arith.constant 0 : i32
    %c0_i32_1 = arith.constant 0 : i32
    return %c0_i32, %c0_i32_0 : i32, i32
  }
  func.func @transform_1(%arg0: i32, %arg1: i32) -> (i32, i32) {
    %c0_i32 = arith.constant 0 : i32
    %c0_i32_0 = arith.constant 0 : i32
    %c0_i32_1 = arith.constant 0 : i32
    return %c0_i32, %c0_i32_0 : i32, i32
  }
  func.func @transform_3(%arg0: i32, %arg1: i32) -> (i32, i32, i32) {
    %c0_i32 = arith.constant 0 : i32
    %c0_i32_0 = arith.constant 0 : i32
    return %arg0, %c0_i32, %arg1 : i32, i32, i32
  }
}

</mosaic_0001>

<bundles_post_ra>
// kernel: tpu_custom_call.1
= control target key start
LH: loop header
LB: loop body
LE: loop exit
PB: predicated region body
PF: predicated region fallthrough
CT: control target
= control target key end

     0   :  { %8 = vsyncpa [#allocation6], 0  ;;  %s1070_s0 = inlined_call_operand.vmem [shape: f32[8,40], index: 0, kind: input, shape index: {}]   ;;  %s1071_s1 = inlined_call_operand.vmem [shape: f32[8,1], index: 1, kind: input, shape index: {}]   ;;  %s1072_s2 = inlined_call_operand.hbm [shape: f32[2,4,640], index: 2, kind: input, shape index: {}]   ;;  %s1073_s3 = inlined_call_operand.hbm [shape: f32[2,8,512], index: 3, kind: output, shape index: {}]  }
   0x1   :  { %10 = vsyncpa [#allocation6 + $0x1], 0  ;;  %s843_s12 = smov 0   ;;  %s845_s13 = smov 0  }
   0x2   :  { %s847_s14 = smov 0   ;;  %s849_s15 = smov 0  }
   0x3   :  { %s851_s16 = smov 0   ;;  %s853_s17 = smov 0  }
   0x4   :  { %s855_s18 = smov 0   ;;  %s857_s19 = smov 0  }
   0x5 LB: > { %1084 = sst [smem:[#allocation15_spill]] %s789_s14  ;;  %s527_s20 = sadd.s32 4294967295, %s809_s19   ;;  %s809_s19 = sphi %s857_s19, %s16_s19   ;;  %s805_s18 = sphi %s855_s18, %s1105_s18   ;;  %s801_s17 = sphi %s853_s17, %s1104_s17   ;;  %s797_s16 = sphi %s851_s16, %s1103_s16   ;;  %s793_s15 = sphi %s849_s15, %s1102_s15   ;;  %s789_s14 = sphi %s847_s14, %s1101_s14   ;;  %s785_s13 = sphi %s845_s13, %s1107_s13   ;;  %s781_s12 = sphi %s843_s12, %s1106_s12  }
   0x6   : > { %1085 = sst [smem:[#allocation16_spill]] %s801_s17  ;;  %s528_s21 = sadd.s32 4294967294, %s809_s19  }
   0x7   : > { %1086 = sst [smem:[#allocation17_spill]] %s805_s18  ;;  %s25_s22 = sadd.s32 1, %s801_s17 }
   0x8   : > { %p26_p0 = scmp.ge.s32.totalorder %s25_s22, 2  ;;  %s28_s23 = sadd.s32 1, %s805_s18 }
   0x9   : > { %p89_p1 = scmp.ne.s32.totalorder %s789_s14, %s785_s13  ;;  %p90_p2 = scmp.eq.s32.totalorder %s527_s20, 3 }
   0xa   : > { %s1109_s22 = smov (%p26_p0, %s25_s22), 0  ;;  %s1111_s23 = smov (!%p26_p0, %s28_s23), %s805_s18 }
   0xb   : > { %1087 = sst [smem:[#allocation18_spill]] %s1109_s22  ;;  %s75_s24 = ssub.s32 %s801_s17, %s1109_s22 }
   0xc   : > { %p894_p3 = por %p90_p2, %p89_p1  ;;  %p30_p4 = scmp.ge.s32.totalorder %s1111_s23, 2 }
   0xd   : > { %p95_p5 = scmp.ne.s32.totalorder %s785_s13, %s781_s12  ;;  %p96_p6 = scmp.eq.s32.totalorder %s528_s21, 3 }
   0xe   : > { %s1088_s25 = scalar_select %p894_p3, 1, 0 }
   0xf   : > { %p530_p7 = scmp.ge.s32.totalorder %s809_s19, 1  ;;  %s1113_s23 = smov (%p30_p4, %s1111_s23), 0 }
  0x10   : > { %1089 = sst [smem:[#allocation19_spill]] %s1113_s23  ;;  %p903_p8 = por %p96_p6, %p95_p5 }
  0x11   : > { %p120_p9 = scmp.lt.s32.totalorder %s809_s19, 5  ;;  %s74_s27 = ssub.s32 %s805_s18, %s1113_s23 }
  0x12   : > { %s1090_s26 = scalar_select %p903_p8, 1, 0 }
  0x13   : > { %s79_s28 = sadd.s32 1, %s789_s14  ;;  %s76_s29 = sor.u32 %s75_s24, %s74_s27 }
  0x14   : > { %1091 = sst [smem:[#allocation20_spill]] %s1090_s26  ;;  %p121_p10 = pnand %p530_p7, %p120_p9 }
  0x15   : > { %p77_p11 = scmp.eq.s32.totalorder %s76_s29, 0  ;;  %s1074_s4 = sand.u32 (!%p121_p10), 1, %s785_s13  }
  0x16   : > { %124 = sbr.rel (%p121_p10) target bundleno = 485 (0x1e5), region = 28  ;;  %p138_p12 = scmp.lt.s32.totalorder (!%p121_p10), %s793_s15, 0 }
  0x17   : > { %s912_s30 = scalar_select %p77_p11, %s789_s14, %s79_s28  }
  0x18   : > { %s918_s5 = sshll.u32 (!%p121_p10), %s1074_s4, 4  ;;  %s139_s6 = ssub.s32 (!%p121_p10), 0, %s793_s15 }
  0x19   : > { %1092 = sst [smem:[#allocation21_spill]] %s912_s30  ;;  %s532_s7 = smin.u32 (!%p121_p10), %s793_s15, %s139_s6 }
  0x1a   : > { %s141_s8 = sand.u32 (!%p121_p10), 1, %s532_s7   ;;  %s552_s11 = smul.u32 (!%p121_p10), 320, %s797_s16 }
  0x1b   : > { %s142_s9 = ssub.s32 (!%p121_p10), 0, %s141_s8  ;;  %p576_p0 = scmp.eq.s32.totalorder (!%p121_p10), %s793_s15, 0 }
  0x1c   : > { %s930_s27 = scalar_lea.hbm (!%p121_p10), %s1072_s2, %s552_s11  ;;  %s1077_s11 = scalar_lea.hbm (!%p121_p10), %s1072_s2, 640 }
  0x1d   : > { %s1115_s9 = smov (!%p138_p12, %s142_s9), %s141_s8  ;;  %s657_s7 = scalar_lea.hbm %s930_s27, 192 }
  0x1e   : > { %p534_p13 = scmp.lt.s32.totalorder %s1115_s9, 0  ;;  %s148_s10 = sadd.s32 2, %s1115_s9 }
  0x1f   : > { %p658_p1 = scmp.ne.s32.totalorder %s930_s27, %s657_s7  ;;  %p662_p5 = scmp.lt.u32.totalorder %s930_s27, %s1072_s2 }
  0x20   : > { %s1117_s10 = smov (!%p534_p13, %s148_s10), %s1115_s9  ;;  %p663_p6 = scmp.lt.u32.totalorder %s1077_s11, %s657_s7 }
  0x21   : > { %s553_s20 = smul.u32 12, %s1117_s10  ;;  %s161_s6 = scalar_lea.sflag [#allocation4], %s1117_s10 }
  0x22   : > { %p659_p2 = pnand %p658_p1, %p576_p0  ;;  %p664_p7 = por %p663_p6, %p662_p5 }
  0x23   : > { %s932_s28 = scalar_lea.vmem [#allocation2], %s553_s20  ;;  %p665_p9 = scmp.lt.u32.totalorder %s657_s7, %s930_s27 }
  0x24   : > { %s169_s29 = sshll.u32 %s932_s28, 4  ;;  %p660_p4 = pneg %p659_p2  ;;  %s170_s29 = int_to_ptr.vmem [resolvable:$true] %s169_s29 }
  0x25   : > { %p666_p10 = por %p665_p9, %p664_p7 }
  0x27   : > { %p667_p11 = pnand %p666_p10, %p660_p4 }
  0x29   : > { %670 = shalt.err (!%p667_p11)  }
  0x2a   : > { %s671_s23 = scalar_lea.vmem %s170_s29, 192  ;;  %s811_s8 = smov [#allocation2]  }
  0x2b   : > { %p672_p12 = scmp.ne.s32.totalorder %s170_s29, %s671_s23  ;;  %s675_s9 = sshll.u32 %s811_s8, 4  ;;  %s954_s9 = int_to_ptr.vmem [resolvable:$false] %s675_s9 }
  0x2c   : > { %s1076_s4 = scalar_lea.vmem %s954_s9, 384  ;;  %p678_p2 = scmp.lt.s32.totalorder %s170_s29, %s954_s9 }
  0x2d   : > { %p673_p13 = pnand %p672_p12, %p576_p0  ;;  %p679_p5 = scmp.lt.s32.totalorder %s1076_s4, %s671_s23 }
  0x2f   : > { %p674_p1 = pneg %p673_p13  ;;  %p680_p6 = por %p679_p5, %p678_p2 }
  0x31   : > { %p681_p4 = pnand %p680_p6, %p674_p1 }
  0x33   : > { %684 = shalt.err (!%p681_p4)  }
  0x34   : > { %567 = dma.hbm_to_vmem [thread:$0]  (%p576_p0), %s930_s27, 192, %s170_s29, %s161_s6 }
  0x35   : > { %s964_s7 = scalar_lea.vmem [#allocation5], %s918_s5 }
  0x36   : > { %773 = dma.done.wait %s161_s6, 192 }
  0x37   : > { %774 = vsyncadd %s161_s6, 4294967104  ;;  %s182_s21 = sadd.s32 1, %s793_s15  ;;  %s187_s24 = ssub.s32 1, %s1117_s10 }
  0x38   : > { %p968_p7 = scmp.lt.s32.totalorder %s182_s21, 2  ;;  %s555_s20 = sshll.u32 %s793_s15, 8 }
  0x39   : > { %s191_s8 = smul.u32 5, %s797_s16  ;;  %s556_s4 = sadd.s32 256, %s555_s20 }
  0x3a   : > { %s557_s11 = smul.u32 12, %s187_s24  ;;  %s189_s27 = sshra.s32 %s556_s4, 7 }
  0x3b   : > { %s192_s5 = sadd.s32 %s191_s8, %s189_s27  ;;  %s198_s10 = scalar_lea.sflag [#allocation4], %s187_s24 }
  0x3c   : > { %s541_s29 = sshll.u32 %s192_s5, 6  ;;  %s197_s22 = scalar_lea.vmem [#allocation2], %s557_s11 }
  0x3d   : > { %s206_s6 = sshll.u32 %s197_s22, 4  ;;  %s194_s30 = scalar_lea.hbm %s1072_s2, %s541_s29  ;;  %s207_s6 = int_to_ptr.vmem [resolvable:$true] %s206_s6 }
  0x3e   : > { %s685_s21 = scalar_lea.hbm %s194_s30, 192  ;;  %p690_p11 = scmp.lt.u32.totalorder %s194_s30, %s1072_s2 }
  0x3f   : > { %p686_p0 = scmp.ne.s32.totalorder %s194_s30, %s685_s21  ;;  %s1094_s11 = scalar_lea.hbm %s1072_s2, 640 }
  0x40   : > { %p691_p12 = scmp.lt.u32.totalorder %s1094_s11, %s685_s21  ;;  %p693_p1 = scmp.lt.u32.totalorder %s685_s21, %s194_s30 }
  0x41   : > { %p687_p9 = pnand %p686_p0, %p968_p7 }
  0x42   : > { %p692_p13 = por %p691_p12, %p690_p11 }
  0x43   : > { %p688_p10 = pneg %p687_p9 }
  0x44   : > { %p694_p2 = por %p693_p1, %p692_p13 }
  0x46   : > { %p695_p5 = pnand %p694_p2, %p688_p10 }
  0x48   : > { %698 = shalt.err (!%p695_p5)  }
  0x49   : > { %s699_s17 = scalar_lea.vmem %s207_s6, 192  ;;  %p706_p9 = scmp.lt.s32.totalorder %s207_s6, %s954_s9 }
  0x4a   : > { %p700_p6 = scmp.ne.s32.totalorder %s207_s6, %s699_s17  ;;  %s1095_s14 = scalar_lea.vmem %s954_s9, 384 }
  0x4b   : > { %p707_p8 = scmp.lt.s32.totalorder %s1095_s14, %s699_s17 }
  0x4c   : > { %p701_p4 = pnand %p700_p6, %p968_p7 }
  0x4d   : > { %p708_p3 = por %p707_p8, %p706_p9 }
  0x4e   : > { %p702_p0 = pneg %p701_p4 }
  0x50   : > { %p709_p11 = pnand %p708_p3, %p702_p0 }
  0x52   : > { %712 = shalt.err (!%p709_p11)  }
  0x53   : > { %569 = dma.hbm_to_vmem [thread:$0]  (%p968_p7), %s194_s30, 192, %s207_s6, %s198_s10  ;;  %v819_v5 = vmov 0.0   ;;  %v821_v6 = vmov 0   ;;  %v337_v7 = vld [vmem:[%s1071_s1] sm:$0xff]  ;;  %vm228_vm0 = vcmask 1039360   ;;  %vm241_vm1 = vcmask 1031168  }
  0x54   : > { %v212_v0 = vld [vmem:[%s932_s28] sm:$0xff]  ;;  %v213_v1 = vld [vmem:[%s932_s28 + $0x8] sm:$0xf]  ;;  %s812_s18 = smov 126   ;;  %s813_s22 = smov 127   ;;  %411 = vmatprep.mubr.f32.mxu0 %v819_v5  ;;  %653 = vset.pattern.permute.xlu0 %v821_v6  ;;  %vm254_vm2 = vcmask 900096  }
  0x55   : > { %217 = vst [vmem:[#allocation3] sm:$0xf] %v212_v0  ;;  %239 = vrot.lane.b32.xlu1 %v213_v1, %s812_s18  ;;  %224 = vrot.lane.b32.xlu0 %v212_v0, %s813_s22  ;;  %v215_v2 = vcombine.high %v212_v0, %v212_v0  ;;  %s814_s26 = smov 110   ;;  %v221_v3 = vcombine.low %v213_v1, %v213_v1  ;;  %s815_s30 = smov 109   ;;  %211 = vst [vmem:[#allocation3 + $0x48] sm:$0xf0] %v819_v5 }
  0x56   : > { %v220_v4 = vcombine.low %v212_v0, %v212_v0  ;;  %s816_s28 = smov 108   ;;  %s817_s9 = smov 92   ;;  %210 = vst [vmem:[#allocation3 + $0x40] sm:$0xf0] %v819_v5  ;;  %vm267_vm3 = vcmask 891904   ;;  %vm280_vm4 = vcmask 883712  }
  0x57   : > { %218 = vst [vmem:[#allocation3 + $0x8] sm:$0xf] %v215_v2  ;;  %s818_s24 = smov 91   ;;  %s820_s23 = smov 90   ;;  %vm293_vm5 = vcmask 752640   ;;  %vm306_vm6 = vcmask 744448  }
  0x58   : > { %vm319_vm7 = vcmask 736256   ;;  %v326_v61 = vld [vmem:[%s1070_s0] sm:$0xff]  ;;  %vm343_vm8 = vcmask 326656   ;;  %s545_s6 = sshll.u32 %s793_s15, 1  ;;  %s546_s10 = sshll.u32 %s797_s16, 2 }
  0x59   : > { %235 = vrot.lane.b32.xlu1 %v212_v0, %s812_s18  ;;  %250 = vrot.lane.b32.xlu0 %v212_v0, %s814_s26  ;;  %s433_s21 = sadd.s32 %s546_s10, %s545_s6  ;;  %s437_s20 = sshll.u32 %s964_s7, 4  ;;  %s1015_s20 = int_to_ptr.vmem [resolvable:$true] %s437_s20 }
  0x5a   : > { %s547_s4 = sshll.u32 %s433_s21, 7  ;;  %s1096_s15 = sand.u32 1, %s785_s13  }
  0x5b   : > { %s1013_s14 = scalar_lea.hbm %s1073_s3, %s547_s4  ;;  %s421_s16 = scalar_lea.sflag [#allocation6], %s1096_s15 }
  0x5c   : > { %p1097_p8 = scmp.ne.s32.totalorder %s1088_s25, 0 }
  0x5d   : > { %226 = vrot.lane.b32.xlu0 %v221_v3, %s813_s22  ;;  %237 = vrot.lane.b32.xlu1 %v215_v2, %s812_s18  ;;  %s713_s18 = scalar_lea.vmem %s1015_s20, 256 }
  0x5e   : > { %p714_p3 = scmp.ne.s32.totalorder %s1015_s20, %s713_s18 }
  0x60   : > { %p715_p7 = pnand %p714_p3, %p1097_p8 }
  0x61   : > { %222 = vrot.lane.b32.xlu0 %v220_v4, %s813_s22  ;;  %252 = vrot.lane.b32.xlu1 %v221_v3, %s814_s26  ;;  %s822_s22 = smov [#allocation5]  }
  0x62   : > { %p716_p10 = pneg %p715_p7 }
  0x65   : > { %248 = vrot.lane.b32.xlu0 %v220_v4, %s814_s26  ;;  %263 = vrot.lane.b32.xlu1 %v215_v2, %s815_s30  ;;  %s717_s26 = sshll.u32 %s822_s22, 4  ;;  %s718_s26 = int_to_ptr.vmem [resolvable:$false] %s717_s26 }
  0x66   : > { %p720_p12 = scmp.lt.s32.totalorder %s1015_s20, %s718_s26 }
  0x69   : > { %265 = vrot.lane.b32.xlu0 %v213_v1, %s815_s30  ;;  %276 = vrot.lane.b32.xlu1 %v212_v0, %s816_s28 }
  0x6d   : > { %278 = vrot.lane.b32.xlu0 %v221_v3, %s816_s28  ;;  %289 = vrot.lane.b32.xlu1 %v215_v2, %s817_s9 }
  0x71   : > { %291 = vrot.lane.b32.xlu0 %v213_v1, %s817_s9  ;;  %302 = vrot.lane.b32.xlu1 %v212_v0, %s818_s24 }
  0x75   : > { %304 = vrot.lane.b32.xlu0 %v221_v3, %s818_s24  ;;  %261 = vrot.lane.b32.xlu1 %v212_v0, %s815_s30  ;;  %s719_s30 = scalar_lea.vmem %s718_s26, 512 }
  0x76   : > { %p721_p13 = scmp.lt.s32.totalorder %s719_s30, %s713_s18 }
  0x78   : > { %p722_p1 = por %p721_p13, %p720_p12 }
  0x79   : > { %274 = vrot.lane.b32.xlu0 %v220_v4, %s816_s28  ;;  %287 = vrot.lane.b32.xlu1 %v212_v0, %s817_s9 }
  0x7a   : > { %p723_p2 = pnand %p722_p1, %p716_p10 }
  0x7d   : > { %300 = vrot.lane.b32.xlu0 %v220_v4, %s818_s24  ;;  %315 = vrot.lane.b32.xlu1 %v215_v2, %s820_s23 }
  0x81   : > { %317 = vrot.lane.b32.xlu0 %v213_v1, %s820_s23  ;;  %313 = vrot.lane.b32.xlu1 %v212_v0, %s820_s23 }
  0x85   : > { %340 = vperm.xlu0 %653, %v337_v7  }
  0xc7   : > { %v240_v8 = vpop.permute.xlu1 %239  ;;  %v225_v9 = vpop.permute.xlu0 %224 }
  0xcb   : > { %v236_v10 = vpop.permute.xlu1 %235  ;;  %v251_v11 = vpop.permute.xlu0 %250 }
  0xcf   : > { %v227_v12 = vpop.permute.xlu0 %226  ;;  %v238_v13 = vpop.permute.xlu1 %237 }
  0xd0   : > { %v230_v14 = vsel %vm228_vm0, %v225_v9, %v227_v12  ;;  %v242_v15 = vsel %vm241_vm1, %v236_v10, %v238_v13  ;;  %v243_v16 = vsel %vm241_vm1, %v238_v13, %v240_v8 }
  0xd1   : > { %234 = vst [vmem:[#allocation3 + $0x8] sm:$0xf0] %v230_v14  ;;  %246 = vst [vmem:[#allocation3 + $0x10] sm:$0xf] %v242_v15 }
  0xd2   : > { %247 = vst [vmem:[#allocation3 + $0x18] sm:$0xf] %v243_v16 }
  0xd3   : > { %v223_v17 = vpop.permute.xlu0 %222  ;;  %v253_v18 = vpop.permute.xlu1 %252 }
  0xd4   : > { %v229_v19 = vsel %vm228_vm0, %v223_v17, %v225_v9  ;;  %v256_v20 = vsel %vm254_vm2, %v251_v11, %v253_v18 }
  0xd5   : > { %233 = vst [vmem:[#allocation3] sm:$0xf0] %v229_v19  ;;  %260 = vst [vmem:[#allocation3 + $0x18] sm:$0xf0] %v256_v20 }
  0xd7   : > { %v249_v21 = vpop.permute.xlu0 %248  ;;  %v264_v22 = vpop.permute.xlu1 %263 }
  0xd8   : > { %v255_v23 = vsel %vm254_vm2, %v249_v21, %v251_v11  ;;  %v328_v27 = vld [vmem:[#allocation3 + $0x8] sm:$0xff] }
  0xd9   : > { %259 = vst [vmem:[#allocation3 + $0x10] sm:$0xf0] %v255_v23 }
  0xdb   : > { %v266_v24 = vpop.permute.xlu0 %265  ;;  %v277_v25 = vpop.permute.xlu1 %276 }
  0xdc   : > { %v269_v26 = vsel %vm267_vm3, %v264_v22, %v266_v24  ;;  %v330_v28 = vld [vmem:[#allocation3 + $0x18] sm:$0xff]  ;;  %v327_v33 = vld [vmem:[#allocation3] sm:$0xff] }
  0xdd   : > { %273 = vst [vmem:[#allocation3 + $0x28] sm:$0xf] %v269_v26  ;;  %v558_v29 = vpack.c.bf16 %v330_v28, %v328_v27 }
  0xdf   : > { %v279_v30 = vpop.permute.xlu0 %278  ;;  %v290_v31 = vpop.permute.xlu1 %289  ;;  %559 = vmatprep.subr.bf16.mxu0 %v558_v29 }
  0xe0   : > { %v282_v32 = vsel %vm280_vm4, %v277_v25, %v279_v30  ;;  %v329_v34 = vld [vmem:[#allocation3 + $0x10] sm:$0xff] }
  0xe1   : > { %286 = vst [vmem:[#allocation3 + $0x28] sm:$0xf0] %v282_v32  ;;  %v560_v35 = vpack.c.bf16 %v329_v34, %v327_v33 }
  0xe3   : > { %v292_v36 = vpop.permute.xlu0 %291  ;;  %v303_v37 = vpop.permute.xlu1 %302  ;;  %561 = vmatpush1.bf16.msra.mxu0 %v560_v35 }
  0xe4   : > { %v295_v38 = vsel %vm293_vm5, %v290_v31, %v292_v36 }
  0xe5   : > { %299 = vst [vmem:[#allocation3 + $0x38] sm:$0xf] %v295_v38 }
  0xe7   : > { %v305_v39 = vpop.permute.xlu0 %304  ;;  %v262_v40 = vpop.permute.xlu1 %261 }
  0xe8   : > { %v308_v41 = vsel %vm306_vm6, %v303_v37, %v305_v39  ;;  %v268_v42 = vsel %vm267_vm3, %v262_v40, %v264_v22  ;;  %v332_v50 = vld [vmem:[#allocation3 + $0x28] sm:$0xff] }
  0xe9   : > { %312 = vst [vmem:[#allocation3 + $0x38] sm:$0xf0] %v308_v41  ;;  %272 = vst [vmem:[#allocation3 + $0x20] sm:$0xf] %v268_v42 }
  0xeb   : > { %v275_v43 = vpop.permute.xlu0 %274  ;;  %v288_v44 = vpop.permute.xlu1 %287 }
  0xec   : > { %v281_v45 = vsel %vm280_vm4, %v275_v43, %v277_v25  ;;  %v294_v46 = vsel %vm293_vm5, %v288_v44, %v290_v31 }
  0xed   : > { %285 = vst [vmem:[#allocation3 + $0x20] sm:$0xf0] %v281_v45  ;;  %298 = vst [vmem:[#allocation3 + $0x30] sm:$0xf] %v294_v46 }
  0xef   : > { %v301_v47 = vpop.permute.xlu0 %300  ;;  %v316_v48 = vpop.permute.xlu1 %315 }
  0xf0   : > { %v307_v49 = vsel %vm306_vm6, %v301_v47, %v303_v37  ;;  %v334_v51 = vld [vmem:[#allocation3 + $0x38] sm:$0xff] }
  0xf1   : > { %311 = vst [vmem:[#allocation3 + $0x30] sm:$0xf0] %v307_v49  ;;  %v562_v52 = vpack.c.bf16 %v334_v51, %v332_v50 }
  0xf3   : > { %v318_v53 = vpop.permute.xlu0 %317  ;;  %v314_v54 = vpop.permute.xlu1 %313  ;;  %563 = vmatprep.subr.bf16.mxu0 %v562_v52 }
  0xf4   : > { %v321_v55 = vsel %vm319_vm7, %v316_v48, %v318_v53  ;;  %v320_v56 = vsel %vm319_vm7, %v314_v54, %v316_v48  ;;  %v331_v57 = vld [vmem:[#allocation3 + $0x20] sm:$0xff] }
  0xf5   : > { %325 = vst [vmem:[#allocation3 + $0x48] sm:$0xf] %v321_v55  ;;  %324 = vst [vmem:[#allocation3 + $0x40] sm:$0xf] %v320_v56 }
  0xf8   : > { %v333_v58 = vld [vmem:[#allocation3 + $0x30] sm:$0xff] }
  0xf9   : > { %v564_v59 = vpack.c.bf16 %v333_v58, %v331_v57 }
  0xfb   : > { %565 = vmatpush1.bf16.msra.mxu0 %v564_v59 }
  0xfc   : > { %v336_v60 = vld [vmem:[#allocation3 + $0x48] sm:$0xff]  ;;  %v335_v62 = vld [vmem:[#allocation3 + $0x40] sm:$0xff] }
  0xfd   : > { %355 = vmatprep.subr.mxu0 %v336_v60 }
  0xff   : > { %356 = vmatpush1.msra.mxu0 %v335_v62 }
 0x100   : > { %543 = vmatmul.mubr.msk.f32.vlgmr.msra.gmra.mrb[0].mxu0 %vm343_vm8, %v326_v61 }
 0x104   : > { %v341_v63 = vpop.permute.xlu0 %340 }
 0x1d3   : > { %v413_v0 = vpop.f32.mrb[0].mxu0 }
 0x1d4   : > { %v414_v1 = vadd.f32 %v413_v0, %v341_v63  ;;  %v415_v2 = vpop.f32.mrb[1].mxu0 }
 0x1d5   : > { %v416_v3 = vadd.f32 %v415_v2, %v341_v63 }
 0x1d6   : > { %418 = vst [vmem:[%s964_s7] sm:$0xff] %v414_v1 }
 0x1d7   : > { %419 = vst [vmem:[%s964_s7 + $0x8] sm:$0xff] %v416_v3 }
 0x1d8   : > { %726 = shalt.err (!%p723_p2)
}
 0x1d9   : > { %s727_s7 = scalar_lea.hbm %s1013_s14, 256  ;;  %s731_s24 = scalar_lea.hbm %s1073_s3, 1024 }
 0x1da   : > { %p728_p5 = scmp.ne.s32.totalorder %s1013_s14, %s727_s7  ;;  %p732_p0 = scmp.lt.u32.totalorder %s1013_s14, %s1073_s3 }
 0x1db   : > { %p733_p9 = scmp.lt.u32.totalorder %s731_s24, %s727_s7  ;;  %p735_p3 = scmp.lt.u32.totalorder %s727_s7, %s1013_s14 }
 0x1dc   : > { %p729_p6 = pnand %p728_p5, %p1097_p8 }
 0x1dd   : > { %p734_p11 = por %p733_p9, %p732_p0 }
 0x1de   : > { %p730_p4 = pneg %p729_p6 }
 0x1df   : > { %p736_p7 = por %p735_p3, %p734_p11 }
 0x1e1   : > { %p737_p10 = pnand %p736_p7, %p730_p4 }
 0x1e3   : > { %740 = shalt.err (!%p737_p10)
}
 0x1e4   : > { %570 = dma.vmem_to_hbm [thread:$0]  (%p1097_p8), %s1015_s20, 256, %s1013_s14, %s421_s16  }
 0x1e5 PF: > { %s1098_s27 = sld [smem:[#allocation20_spill]]  ;;  %p578_p12 = scmp.ge.s32.totalorder %s809_s19, 2 }
 0x1e6   : > { %s449_s5 = sand.u32 1, %s781_s12  }
 0x1e7   : > { %s450_s29 = scalar_lea.sflag [#allocation6], %s449_s5 }
 0x1eb   : > { %p1099_p13 = scmp.ne.s32.totalorder %s1098_s27, 0 }
 0x1ed   : > { %p573_p1 = pnand %p578_p12, %p1099_p13 }
 0x1ef   : > { %776 = dma.done.wait (!%p573_p1), %s450_s29, 256  }
 0x1f0   : > { %778 = vsyncadd (!%p573_p1), %s450_s29, 4294967040  ;;  %s16_s19 = sadd.s32 1, %s809_s19   ;;  %s1100_s6 = sld [smem:[#allocation15_spill]] }
 0x1f1   : > { %p13_p2 = scmp.ge.s32.totalorder %s16_s19, 6   ;;  %s1101_s14 = sld [smem:[#allocation21_spill]] }
 0x1f2   : > { %s1102_s15 = sld [smem:[#allocation16_spill]]  ;;  %s1103_s16 = sld [smem:[#allocation17_spill]] }
 0x1f3   : > { %s1104_s17 = sld [smem:[#allocation18_spill]]  ;;  %s1105_s18 = sld [smem:[#allocation19_spill]] }
 0x1f4   : > { %s1106_s12 = smov %s785_s13  ;;  %15 = sbr.rel (!%p13_p2) target bundleno = 5 (0x5), region = 85 }
 0x1f6   : > { %s1107_s13 = smov %s1100_s6 }
 0x1fb   :  { %455 = vsyncpa [#allocation6], 1 }
 0x1fc   :  { %457 = vsyncpa [#allocation6 + $0x1], 1 }
 0x1fd   :  { %458 = vsyncmov [#allocation4] }
 0x200   :  { %s459_s25 = vpop.sfrf %458 }
 0x201   :  { %p550_p8 = scmp.ne.s32.totalorder %s459_s25, 0 }
 0x203   :  { %463 = shalt.err (%p550_p8)  }
 0x204   :  { %465 = vsyncmov [#allocation4 + $0x1] }
 0x207   :  { %s466_s10 = vpop.sfrf %465 }
 0x208   :  { %p551_p5 = scmp.ne.s32.totalorder %s466_s10, 0 }
 0x20a   :  { %470 = shalt.err (%p551_p5)  }

</bundles_post_ra>
